<compile_context>
chip_gen: v7x
topology: tpu7x:2x2x1
jax: 0.10.0
libtpu: 0.0.40
codegen_flags: <defaults>
</compile_context>

<pallas_src>
import functools

import jax
import jax.numpy as jnp
from jax.experimental import pallas as pl
from jax.experimental.pallas import tpu as pltpu


def _round_up(n, m):
    return ((n + m - 1) // m) * m


def _actor_kernel(x_ref, w1_ref, b1_ref, w2_ref, b2_ref, w3_ref, b3_ref,
                  w4_ref, b4_ref, o_ref, *, max_action):
    """Fused 4-layer MLP on one (TB, state_dim) batch tile.

    Weights arrive as bf16 (MXU-native), biases as f32. All accumulation and
    elementwise math is f32; activations are re-cast to bf16 only as matmul
    inputs.
    """
    x = x_ref[...].astype(jnp.bfloat16)

    # Layer 1: state_dim -> 128, ReLU
    h = jnp.dot(x, w1_ref[...], preferred_element_type=jnp.float32) + b1_ref[...]
    h = jnp.maximum(h, 0.0).astype(jnp.bfloat16)

    # Layer 2: 128 -> 256, ReLU
    h = jnp.dot(h, w2_ref[...], preferred_element_type=jnp.float32) + b2_ref[...]
    h = jnp.maximum(h, 0.0).astype(jnp.bfloat16)

    # Layer 3: 256 -> 128, ReLU
    h = jnp.dot(h, w3_ref[...], preferred_element_type=jnp.float32) + b3_ref[...]
    h = jnp.maximum(h, 0.0).astype(jnp.bfloat16)

    # Layer 4: 128 -> padded_action_dim, Tanh, scale by max_action (f32 EUP/VPU)
    h = jnp.dot(h, w4_ref[...], preferred_element_type=jnp.float32) + b4_ref[...]
    o_ref[...] = (max_action * jnp.tanh(h)).astype(o_ref.dtype)


def actor_forward(x, params, max_action, *, batch_tile=512):
    """x: (batch, state_dim) float32. params: dict of w1..w4 (in,out), b1..b4 (1,out)."""
    batch, state_dim = x.shape
    action_dim = params["w4"].shape[1]

    # --- Pad the output feature dim to 128 lanes for lane-dense stores. ---
    padded_adim = max(128, _round_up(action_dim, 128))
    w4 = params["w4"]
    b4 = params["b4"]
    if padded_adim != action_dim:
        w4 = jnp.pad(w4, ((0, 0), (0, padded_adim - action_dim)))
        b4 = jnp.pad(b4, ((0, 0), (0, padded_adim - action_dim)))

    # --- Cast matmul weights to bf16 (f32 biases for f32 bias-add). ---
    w1 = params["w1"].astype(jnp.bfloat16)
    w2 = params["w2"].astype(jnp.bfloat16)
    w3 = params["w3"].astype(jnp.bfloat16)
    w4 = w4.astype(jnp.bfloat16)
    b1 = params["b1"].astype(jnp.float32)
    b2 = params["b2"].astype(jnp.float32)
    b3 = params["b3"].astype(jnp.float32)
    b4 = b4.astype(jnp.float32)

    # --- Batch tiling: big tile for big batches, single block otherwise. ---
    if batch <= 256:
        tb = batch                      # one block; full-dim block is always legal
    else:
        tb = batch_tile                 # multiple of 8 -> legal sublane tiling
    padded_batch = _round_up(batch, tb)
    if padded_batch != batch:
        x = jnp.pad(x, ((0, padded_batch - batch), (0, 0)))
    num_tiles = padded_batch // tb

    # --- Explicit BlockSpecs (no late-binding lambdas). ---
    x_spec = pl.BlockSpec((tb, state_dim), lambda i: (i, 0))
    w1_spec = pl.BlockSpec(w1.shape, lambda i: (0, 0))
    b1_spec = pl.BlockSpec(b1.shape, lambda i: (0, 0))
    w2_spec = pl.BlockSpec(w2.shape, lambda i: (0, 0))
    b2_spec = pl.BlockSpec(b2.shape, lambda i: (0, 0))
    w3_spec = pl.BlockSpec(w3.shape, lambda i: (0, 0))
    b3_spec = pl.BlockSpec(b3.shape, lambda i: (0, 0))
    w4_spec = pl.BlockSpec(w4.shape, lambda i: (0, 0))
    b4_spec = pl.BlockSpec(b4.shape, lambda i: (0, 0))
    out_spec = pl.BlockSpec((tb, padded_adim), lambda i: (i, 0))

    out_padded = pl.pallas_call(
        functools.partial(_actor_kernel, max_action=float(max_action)),
        out_shape=jax.ShapeDtypeStruct((padded_batch, padded_adim), jnp.float32),
        grid=(num_tiles,),
        in_specs=[x_spec, w1_spec, b1_spec, w2_spec, b2_spec,
                  w3_spec, b3_spec, w4_spec, b4_spec],
        out_specs=out_spec,
        compiler_params=pltpu.CompilerParams(
            dimension_semantics=("parallel",)),   # shards batch tiles over v7x's 2 TCs
    )(x, w1, b1, w2, b2, w3, b3, w4, b4)

    return out_padded[:batch, :action_dim]


def init_actor_params(key, state_dim, action_dim):
    """Deterministic init mimicking PyTorch nn.Linear default (U[-1/sqrt(in), 1/sqrt(in)]).
    Weights are stored transposed: (in_features, out_features)."""
    dims = [(state_dim, 128), (128, 256), (256, 128), (128, action_dim)]
    params = {}
    for i, (fan_in, fan_out) in enumerate(dims, start=1):
        key, kw, kb = jax.random.split(key, 3)
        bound = 1.0 / jnp.sqrt(jnp.float32(fan_in))
        params[f"w{i}"] = jax.random.uniform(
            kw, (fan_in, fan_out), jnp.float32, minval=-bound, maxval=bound)
        params[f"b{i}"] = jax.random.uniform(
            kb, (1, fan_out), jnp.float32, minval=-bound, maxval=bound)
    return params


def actor_forward_ref(x, params, max_action):
    """Pure-JAX f32 reference for correctness check."""
    h = jnp.maximum(x @ params["w1"] + params["b1"], 0.0)
    h = jnp.maximum(h @ params["w2"] + params["b2"], 0.0)
    h = jnp.maximum(h @ params["w3"] + params["b3"], 0.0)
    return max_action * jnp.tanh(h @ params["w4"] + params["b4"])


if __name__ == "__main__":
    state_dim = 16
    action_dim = 4
    max_action = 2.0

    key = jax.random.PRNGKey(0)
    params = init_actor_params(key, state_dim, action_dim)

    # bf16 matmul inputs (f32 accumulation) -> loosened tolerance vs f32 reference.
    TOL = 5e-2

    # Case 1: tiny batch (single block path).
    key, kx = jax.random.split(key)
    x_small = jax.random.normal(kx, (2, state_dim), jnp.float32)
    out_small = jax.block_until_ready(actor_forward(x_small, params, max_action))
    ref_small = actor_forward_ref(x_small, params, max_action)
    assert out_small.shape == (2, action_dim)
    assert jnp.allclose(out_small, ref_small, atol=TOL, rtol=TOL)

    # Case 2: large ragged batch (gridded, padded, multi-tile path).
    key, kx2 = jax.random.split(key)
    x_big = jax.random.normal(kx2, (1000, state_dim), jnp.float32)
    out_big = jax.block_until_ready(actor_forward(x_big, params, max_action))
    ref_big = actor_forward_ref(x_big, params, max_action)
    assert out_big.shape == (1000, action_dim)
    assert jnp.allclose(out_big, ref_big, atol=TOL, rtol=TOL)

    print("KERNEL_OK")
</pallas_src>

<mosaic_0001>
module attributes {stable_mosaic.version = 11 : i64} {
  func.func @_actor_kernel(%arg0: i32, %arg1: memref<2x16xf32, #tpu.memory_space<vmem>>, %arg2: memref<16x128xbf16, #tpu.memory_space<vmem>>, %arg3: memref<1x128xf32, #tpu.memory_space<vmem>>, %arg4: memref<128x256xbf16, #tpu.memory_space<vmem>>, %arg5: memref<1x256xf32, #tpu.memory_space<vmem>>, %arg6: memref<256x128xbf16, #tpu.memory_space<vmem>>, %arg7: memref<1x128xf32, #tpu.memory_space<vmem>>, %arg8: memref<128x128xbf16, #tpu.memory_space<vmem>>, %arg9: memref<1x128xf32, #tpu.memory_space<vmem>>, %arg10: memref<2x128xf32, #tpu.memory_space<vmem>>) attributes {dimension_semantics = [#tpu.dimension_semantics<parallel>], iteration_bounds = array<i64: 1>, scalar_prefetch = 0 : i64, scratch_operands = 0 : i64, tpu.core_type = #tpu.core_type<tc>, window_params = [{transform_indices = @transform_0, window_bounds = array<i64: 2, 16>}, {pipeline_mode = #tpu.pipeline_mode<synchronous>, transform_indices = @transform_1, window_bounds = array<i64: 16, 128>}, {pipeline_mode = #tpu.pipeline_mode<synchronous>, transform_indices = @transform_2, window_bounds = array<i64: 1, 128>}, {pipeline_mode = #tpu.pipeline_mode<synchronous>, transform_indices = @transform_3, window_bounds = array<i64: 128, 256>}, {pipeline_mode = #tpu.pipeline_mode<synchronous>, transform_indices = @transform_4, window_bounds = array<i64: 1, 256>}, {pipeline_mode = #tpu.pipeline_mode<synchronous>, transform_indices = @transform_5, window_bounds = array<i64: 256, 128>}, {pipeline_mode = #tpu.pipeline_mode<synchronous>, transform_indices = @transform_6, window_bounds = array<i64: 1, 128>}, {pipeline_mode = #tpu.pipeline_mode<synchronous>, transform_indices = @transform_7, window_bounds = array<i64: 128, 128>}, {pipeline_mode = #tpu.pipeline_mode<synchronous>, transform_indices = @transform_8, window_bounds = array<i64: 1, 128>}, {transform_indices = @transform_9, window_bounds = array<i64: 2, 128>}]} {
    %c0 = arith.constant 0 : index
    %c0_0 = arith.constant 0 : index
    %0 = vector.load %arg1[%c0, %c0_0] : memref<2x16xf32, #tpu.memory_space<vmem>>, vector<2x16xf32>
    %1 = arith.truncf %0 : vector<2x16xf32> to vector<2x16xbf16>
    %c0_1 = arith.constant 0 : index
    %c0_2 = arith.constant 0 : index
    %2 = vector.load %arg2[%c0_1, %c0_2] : memref<16x128xbf16, #tpu.memory_space<vmem>>, vector<16x128xbf16>
    %cst = arith.constant dense<0.000000e+00> : vector<2x128xf32>
    %3 = tpu.matmul %1, %2, %cst {dimension_numbers = #tpu.dot_dimension_numbers<[1], [0], [0], [1], [0, 0, 1, 1], [], []>} : vector<2x16xbf16>, vector<16x128xbf16>, vector<2x128xf32> -> vector<2x128xf32>
    %c0_3 = arith.constant 0 : index
    %c0_4 = arith.constant 0 : index
    %4 = vector.load %arg3[%c0_3, %c0_4] : memref<1x128xf32, #tpu.memory_space<vmem>>, vector<1x128xf32>
    %5 = vector.broadcast %4 : vector<1x128xf32> to vector<2x128xf32>
    %6 = arith.addf %3, %5 : vector<2x128xf32>
    %cst_5 = arith.constant 0.000000e+00 : f32
    %7 = vector.broadcast %cst_5 : f32 to vector<2x128xf32>
    %8 = arith.maximumf %6, %7 : vector<2x128xf32>
    %9 = arith.truncf %8 : vector<2x128xf32> to vector<2x128xbf16>
    %c0_6 = arith.constant 0 : index
    %c0_7 = arith.constant 0 : index
    %10 = vector.load %arg4[%c0_6, %c0_7] : memref<128x256xbf16, #tpu.memory_space<vmem>>, vector<128x256xbf16>
    %cst_8 = arith.constant dense<0.000000e+00> : vector<2x256xf32>
    %11 = tpu.matmul %9, %10, %cst_8 {dimension_numbers = #tpu.dot_dimension_numbers<[1], [0], [0], [1], [0, 0, 1, 1], [], []>} : vector<2x128xbf16>, vector<128x256xbf16>, vector<2x256xf32> -> vector<2x256xf32>
    %c0_9 = arith.constant 0 : index
    %c0_10 = arith.constant 0 : index
    %12 = vector.load %arg5[%c0_9, %c0_10] : memref<1x256xf32, #tpu.memory_space<vmem>>, vector<1x256xf32>
    %13 = vector.broadcast %12 : vector<1x256xf32> to vector<2x256xf32>
    %14 = arith.addf %11, %13 : vector<2x256xf32>
    %cst_11 = arith.constant 0.000000e+00 : f32
    %15 = vector.broadcast %cst_11 : f32 to vector<2x256xf32>
    %16 = arith.maximumf %14, %15 : vector<2x256xf32>
    %17 = arith.truncf %16 : vector<2x256xf32> to vector<2x256xbf16>
    %c0_12 = arith.constant 0 : index
    %c0_13 = arith.constant 0 : index
    %18 = vector.load %arg6[%c0_12, %c0_13] : memref<256x128xbf16, #tpu.memory_space<vmem>>, vector<256x128xbf16>
    %cst_14 = arith.constant dense<0.000000e+00> : vector<2x128xf32>
    %19 = tpu.matmul %17, %18, %cst_14 {dimension_numbers = #tpu.dot_dimension_numbers<[1], [0], [0], [1], [0, 0, 1, 1], [], []>} : vector<2x256xbf16>, vector<256x128xbf16>, vector<2x128xf32> -> vector<2x128xf32>
    %c0_15 = arith.constant 0 : index
    %c0_16 = arith.constant 0 : index
    %20 = vector.load %arg7[%c0_15, %c0_16] : memref<1x128xf32, #tpu.memory_space<vmem>>, vector<1x128xf32>
    %21 = vector.broadcast %20 : vector<1x128xf32> to vector<2x128xf32>
    %22 = arith.addf %19, %21 : vector<2x128xf32>
    %cst_17 = arith.constant 0.000000e+00 : f32
    %23 = vector.broadcast %cst_17 : f32 to vector<2x128xf32>
    %24 = arith.maximumf %22, %23 : vector<2x128xf32>
    %25 = arith.truncf %24 : vector<2x128xf32> to vector<2x128xbf16>
    %c0_18 = arith.constant 0 : index
    %c0_19 = arith.constant 0 : index
    %26 = vector.load %arg8[%c0_18, %c0_19] : memref<128x128xbf16, #tpu.memory_space<vmem>>, vector<128x128xbf16>
    %cst_20 = arith.constant dense<0.000000e+00> : vector<2x128xf32>
    %27 = tpu.matmul %25, %26, %cst_20 {dimension_numbers = #tpu.dot_dimension_numbers<[1], [0], [0], [1], [0, 0, 1, 1], [], []>} : vector<2x128xbf16>, vector<128x128xbf16>, vector<2x128xf32> -> vector<2x128xf32>
    %c0_21 = arith.constant 0 : index
    %c0_22 = arith.constant 0 : index
    %28 = vector.load %arg9[%c0_21, %c0_22] : memref<1x128xf32, #tpu.memory_space<vmem>>, vector<1x128xf32>
    %29 = vector.broadcast %28 : vector<1x128xf32> to vector<2x128xf32>
    %30 = arith.addf %27, %29 : vector<2x128xf32>
    %31 = math.tanh %30 : vector<2x128xf32>
    %cst_23 = arith.constant 2.000000e+00 : f32
    %32 = vector.broadcast %cst_23 : f32 to vector<2x128xf32>
    %33 = arith.mulf %32, %31 : vector<2x128xf32>
    %c0_24 = arith.constant 0 : index
    %c0_25 = arith.constant 0 : index
    %34 = vector.load %arg10[%c0_24, %c0_25] : memref<2x128xf32, #tpu.memory_space<vmem>>, vector<2x128xf32>
    tpu.vector_store %arg10[%c0_24, %c0_25], %33 {strides = array<i32>} : memref<2x128xf32, #tpu.memory_space<vmem>>, vector<2x128xf32>,
    return
  }
  func.func @transform_0(%arg0: i32) -> (i32, i32) {
    %c0_i32 = arith.constant 0 : i32
    %c0_i32_0 = arith.constant 0 : i32
    return %arg0, %c0_i32 : i32, i32
  }
  func.func @transform_1(%arg0: i32) -> (i32, i32) {
    %c0_i32 = arith.constant 0 : i32
    %c0_i32_0 = arith.constant 0 : i32
    %c0_i32_1 = arith.constant 0 : i32
    return %c0_i32, %c0_i32_0 : i32, i32
  }
  func.func @transform_2(%arg0: i32) -> (i32, i32) {
    %c0_i32 = arith.constant 0 : i32
    %c0_i32_0 = arith.constant 0 : i32
    %c0_i32_1 = arith.constant 0 : i32
    return %c0_i32, %c0_i32_0 : i32, i32
  }
  func.func @transform_3(%arg0: i32) -> (i32, i32) {
    %c0_i32 = arith.constant 0 : i32
    %c0_i32_0 = arith.constant 0 : i32
    %c0_i32_1 = arith.constant 0 : i32
    return %c0_i32, %c0_i32_0 : i32, i32
  }
  func.func @transform_4(%arg0: i32) -> (i32, i32) {
    %c0_i32 = arith.constant 0 : i32
    %c0_i32_0 = arith.constant 0 : i32
    %c0_i32_1 = arith.constant 0 : i32
    return %c0_i32, %c0_i32_0 : i32, i32
  }
  func.func @transform_5(%arg0: i32) -> (i32, i32) {
    %c0_i32 = arith.constant 0 : i32
    %c0_i32_0 = arith.constant 0 : i32
    %c0_i32_1 = arith.constant 0 : i32
    return %c0_i32, %c0_i32_0 : i32, i32
  }
  func.func @transform_6(%arg0: i32) -> (i32, i32) {
    %c0_i32 = arith.constant 0 : i32
    %c0_i32_0 = arith.constant 0 : i32
    %c0_i32_1 = arith.constant 0 : i32
    return %c0_i32, %c0_i32_0 : i32, i32
  }
  func.func @transform_7(%arg0: i32) -> (i32, i32) {
    %c0_i32 = arith.constant 0 : i32
    %c0_i32_0 = arith.constant 0 : i32
    %c0_i32_1 = arith.constant 0 : i32
    return %c0_i32, %c0_i32_0 : i32, i32
  }
  func.func @transform_8(%arg0: i32) -> (i32, i32) {
    %c0_i32 = arith.constant 0 : i32
    %c0_i32_0 = arith.constant 0 : i32
    %c0_i32_1 = arith.constant 0 : i32
    return %c0_i32, %c0_i32_0 : i32, i32
  }
  func.func @transform_9(%arg0: i32) -> (i32, i32) {
    %c0_i32 = arith.constant 0 : i32
    %c0_i32_0 = arith.constant 0 : i32
    return %arg0, %c0_i32 : i32, i32
  }
}

</mosaic_0001>

<bundles_post_ra>
// kernel: tpu_custom_call.1
= control target key start
LH: loop header
LB: loop body
LE: loop exit
PB: predicated region body
PF: predicated region fallthrough
CT: control target
= control target key end

     0   :  { %14 = vsyncpa [#allocation3], 0  ;;  %s1101_s0 = inlined_call_operand.hbm [shape: f32[2,16], index: 0, kind: input, shape index: {}]   ;;  %s1102_s1 = inlined_call_operand.hbm [shape: bf16[16,128], index: 1, kind: input, shape index: {}]   ;;  %s1103_s2 = inlined_call_operand.vmem [shape: f32[1,128], index: 2, kind: input, shape index: {}]   ;;  %s1104_s3 = inlined_call_operand.hbm [shape: bf16[128,256], index: 3, kind: input, shape index: {}]   ;;  %s1105_s4 = inlined_call_operand.vmem [shape: f32[1,256], index: 4, kind: input, shape index: {}]   ;;  %s1106_s5 = inlined_call_operand.hbm [shape: bf16[256,128], index: 5, kind: input, shape index: {}]   ;;  %s1107_s6 = inlined_call_operand.vmem [shape: f32[1,128], index: 6, kind: input, shape index: {}]   ;;  %s1108_s7 = inlined_call_operand.hbm [shape: bf16[128,128], index: 7, kind: input, shape index: {}]   ;;  %s1109_s8 = inlined_call_operand.vmem [shape: f32[1,128], index: 8, kind: input, shape index: {}]   ;;  %s1110_s9 = inlined_call_operand.hbm [shape: f32[2,128], index: 9, kind: output, shape index: {}]  }
   0x1   :  { %15 = vsyncpa [#allocation6], 0 }
   0x2   :  { %16 = vsyncpa [#allocation9], 0 }
   0x3   :  { %17 = vsyncpa [#allocation4], 0  ;;  %s932_s30 = smov [#allocation5]   ;;  %s792_s13 = scalar_lea.hbm %s1102_s1, 128 }
   0x4   :  { %s33_s10 = sshll.u32 %s932_s30, 4  ;;  %p793_p0 = scmp.ne.s32.totalorder %s1102_s1, %s792_s13  ;;  %s34_s10 = int_to_ptr.vmem [resolvable:$true] %s33_s10 }
   0x5   :  { %p796_p1 = scmp.lt.u32.totalorder %s792_s13, %s1102_s1 }
   0x7   :  { %p798_p2 = pnand %p796_p1, %p793_p0 }
   0x9   :  { %801 = shalt.err (!%p798_p2)
}
   0xa   :  { %s802_s18 = scalar_lea.vmem %s34_s10, 128  ;;  %p807_p4 = scmp.lt.s32.totalorder %s34_s10, %s34_s10 }
   0xb   :  { %p803_p3 = scmp.ne.s32.totalorder %s34_s10, %s802_s18  ;;  %p808_p5 = scmp.lt.s32.totalorder %s802_s18, %s802_s18 }
   0xd   :  { %p809_p6 = por %p808_p5, %p807_p4 }
   0xf   :  { %p810_p7 = pnand %p809_p6, %p803_p3 }
  0x11   :  { %813 = shalt.err (!%p810_p7)
}
  0x12   :  { %s933_s19 = smov 64   ;;  %s934_s20 = smov 4  }
  0x13   :  { %39 = dma.hbm_to_vmem [thread:$0]  %s1102_s1, 128, %s34_s10, [#allocation6], %s933_s19, %s933_s19, %s934_s20  }
  0x14   :  { %s935_s23 = smov [#allocation8]   ;;  %s936_s25 = smov [#allocation2]  }
  0x15   :  { %s61_s24 = sshll.u32 %s935_s23, 4  ;;  %s24_s26 = sshll.u32 %s936_s25, 4  ;;  %s62_s24 = int_to_ptr.vmem [resolvable:$true] %s61_s24  ;;  %s25_s26 = int_to_ptr.vmem [resolvable:$true] %s24_s26 }
  0x16   :  { %s814_s29 = scalar_lea.hbm %s1106_s5, 2048 }
  0x17   :  { %p815_p8 = scmp.ne.s32.totalorder %s1106_s5, %s814_s29  ;;  %p818_p9 = scmp.lt.u32.totalorder %s814_s29, %s1106_s5 }
  0x19   :  { %p820_p10 = pnand %p818_p9, %p815_p8 }
  0x1b   :  { %823 = shalt.err (!%p820_p10)
}
  0x1c   :  { %s824_s1 = scalar_lea.vmem %s62_s24, 2048  ;;  %p829_p12 = scmp.lt.s32.totalorder %s62_s24, %s62_s24 }
  0x1d   :  { %p825_p11 = scmp.ne.s32.totalorder %s62_s24, %s824_s1  ;;  %p830_p13 = scmp.lt.s32.totalorder %s824_s1, %s824_s1 }
  0x1f   :  { %p831_p0 = por %p830_p13, %p829_p12 }
  0x21   :  { %p832_p1 = pnand %p831_p0, %p825_p11 }
  0x23   :  { %835 = shalt.err (!%p832_p1)
}
  0x24   :  { %67 = dma.hbm_to_vmem [thread:$0]  %s1106_s5, 2048, %s62_s24, [#allocation9], %s933_s19, %s933_s19, %s934_s20  }
  0x25   :  { %s836_s17 = scalar_lea.hbm %s1101_s0, 32 }
  0x26   :  { %p837_p2 = scmp.ne.s32.totalorder %s1101_s0, %s836_s17  ;;  %p840_p3 = scmp.lt.u32.totalorder %s836_s17, %s1101_s0 }
  0x28   :  { %p842_p4 = pnand %p840_p3, %p837_p2 }
  0x2a   :  { %845 = shalt.err (!%p842_p4)
}
  0x2b   :  { %s846_s25 = scalar_lea.vmem %s25_s26, 32  ;;  %p851_p6 = scmp.lt.s32.totalorder %s25_s26, %s25_s26 }
  0x2c   :  { %p847_p5 = scmp.ne.s32.totalorder %s25_s26, %s846_s25  ;;  %p852_p7 = scmp.lt.s32.totalorder %s846_s25, %s846_s25 }
  0x2e   :  { %p853_p8 = por %p852_p7, %p851_p6 }
  0x30   :  { %p854_p9 = pnand %p853_p8, %p847_p5 }
  0x32   :  { %857 = shalt.err (!%p854_p9)
}
  0x33   :  { %27 = dma.hbm_to_vmem [thread:$0]  %s1101_s0, 32, %s25_s26, [#allocation3]  }
  0x34   :  { %s937_s27 = smov [#allocation7]   ;;  %s858_s11 = scalar_lea.hbm %s1104_s3, 2048 }
  0x35   :  { %s47_s28 = sshll.u32 %s937_s27, 4  ;;  %p859_p10 = scmp.ne.s32.totalorder %s1104_s3, %s858_s11  ;;  %s48_s28 = int_to_ptr.vmem [resolvable:$true] %s47_s28 }
  0x36   :  { %p862_p11 = scmp.lt.u32.totalorder %s858_s11, %s1104_s3 }
  0x38   :  { %p864_p12 = pnand %p862_p11, %p859_p10 }
  0x3a   :  { %867 = shalt.err (!%p864_p12)
}
  0x3b   :  { %s868_s14 = scalar_lea.vmem %s48_s28, 2048  ;;  %p873_p0 = scmp.lt.s32.totalorder %s48_s28, %s48_s28 }
  0x3c   :  { %p869_p13 = scmp.ne.s32.totalorder %s48_s28, %s868_s14  ;;  %p874_p1 = scmp.lt.s32.totalorder %s868_s14, %s868_s14 }
  0x3e   :  { %p875_p2 = por %p874_p1, %p873_p0 }
  0x40   :  { %p876_p3 = pnand %p875_p2, %p869_p13 }
  0x42   :  { %879 = shalt.err (!%p876_p3)
}
  0x43   :  { %s938_s0 = smov 128   ;;  %s939_s26 = smov 8  }
  0x44   :  { %53 = dma.hbm_to_vmem [thread:$0]  %s1104_s3, 2048, %s48_s28, [#allocation6], %s938_s0, %s938_s0, %s939_s26  }
  0x45   :  { %s940_s17 = smov [#allocation10]   ;;  %s880_s23 = scalar_lea.hbm %s1108_s7, 1024 }
  0x46   :  { %s75_s18 = sshll.u32 %s940_s17, 4  ;;  %p881_p4 = scmp.ne.s32.totalorder %s1108_s7, %s880_s23  ;;  %s76_s18 = int_to_ptr.vmem [resolvable:$true] %s75_s18 }
  0x47   :  { %p884_p5 = scmp.lt.u32.totalorder %s880_s23, %s1108_s7 }
  0x49   :  { %p886_p6 = pnand %p884_p5, %p881_p4 }
  0x4b   :  { %889 = shalt.err (!%p886_p6)
}
  0x4c   :  { %s890_s29 = scalar_lea.vmem %s76_s18, 1024  ;;  %p895_p8 = scmp.lt.s32.totalorder %s76_s18, %s76_s18 }
  0x4d   :  { %p891_p7 = scmp.ne.s32.totalorder %s76_s18, %s890_s29  ;;  %p896_p9 = scmp.lt.s32.totalorder %s890_s29, %s890_s29 }
  0x4f   :  { %p897_p10 = por %p896_p9, %p895_p8 }
  0x51   :  { %p898_p11 = pnand %p897_p10, %p891_p7 }
  0x53   :  { %901 = shalt.err (!%p898_p11)
}
  0x54   :  { %81 = dma.hbm_to_vmem [thread:$0]  %s1108_s7, 1024, %s76_s18, [#allocation9], %s933_s19, %s933_s19, %s934_s20  }
  0x55   :  { %924 = dma.done.wait [#allocation3], 32  }
  0x56   :  { %925 = vsyncadd [#allocation3], 4294967264 }
  0x57   :  { %926 = dma.done.wait [#allocation6], 2176  }
  0x58   :  { %927 = vsyncadd [#allocation6], 4294965120 }
  0x59   :  { %928 = dma.done.wait [#allocation9], 3072  }
  0x5a   :  { %929 = vsyncadd [#allocation9], 4294964224  ;;  %v941_v0 = vmov 0.0   ;;  %vm942_vm0 = vmmov 0   ;;  %v741_v1 = vld [vmem:[#allocation5] sm:$0xff]   ;;  %vm117_vm1 = vcmask 130048   ;;  %v181_v51 = vlaneseq }
  0x5b   :  { %702 = vmatprep.subr.bf16.mxu0 %v941_v0  ;;  %704 = vmatprep.mubr.msk.bf16.mxu0 %vm942_vm0, %v941_v0  ;;  %v100_v2 = vld [vmem:[#allocation2] sm:$0x3]  ;;  %v742_v4 = vld [vmem:[#allocation7 + $0x4] ss:$8 sps:$4 sm:$0xff]   ;;  %v744_v5 = vld [vmem:[#allocation7] ss:$8 sps:$4 sm:$0xff]  }
  0x5c   :  { %703 = vmatpush3.bf16.msra.mxu0 %v741_v1  ;;  %v101_v3 = vpack.c.bf16 %v100_v2, %v100_v2  ;;  %v745_v6 = vld [vmem:[#allocation7 + $0x14] ss:$8 sps:$4 sm:$0xff]   ;;  %271 = vmatprep.subr.bf16.mxu1 %v742_v4  ;;  %v747_v7 = vld [vmem:[#allocation7 + $0x10] ss:$8 sps:$4 sm:$0xff]   ;;  %v748_v8 = vld [vmem:[#allocation7 + $0x24] ss:$8 sps:$4 sm:$0xff]  }
  0x5d   :  { %272 = vmatpush1.bf16.msra.mxu1 %v744_v5  ;;  %v750_v9 = vld [vmem:[#allocation7 + $0x20] ss:$8 sps:$4 sm:$0xff]   ;;  %v751_v10 = vld [vmem:[#allocation7 + $0x34] ss:$8 sps:$4 sm:$0xff]   ;;  %v753_v11 = vld [vmem:[#allocation7 + $0x30] ss:$8 sps:$4 sm:$0xff]  }
  0x5e   :  { %273 = vmatprep.subr.bf16.mxu1 %v745_v6  ;;  %v754_v12 = vld [vmem:[#allocation7 + $0x44] ss:$8 sps:$4 sm:$0xff]   ;;  %v756_v13 = vld [vmem:[#allocation7 + $0x40] ss:$8 sps:$4 sm:$0xff]   ;;  %v757_v14 = vld [vmem:[#allocation7 + $0x54] ss:$8 sps:$4 sm:$0xff]  }
  0x5f   :  { %705 = vmatmul.mubr.msk.bf16.vlgmr.msra.gmra.mrb[0].mxu0 %vm117_vm1, %v101_v3  ;;  %v759_v15 = vld [vmem:[#allocation7 + $0x50] ss:$8 sps:$4 sm:$0xff]   ;;  %v760_v16 = vld [vmem:[#allocation7 + $0x64] ss:$8 sps:$4 sm:$0xff]   ;;  %v762_v17 = vld [vmem:[#allocation7 + $0x60] ss:$8 sps:$4 sm:$0xff]  }
  0x60   :  { %v763_v18 = vld [vmem:[#allocation7 + $0x74] ss:$8 sps:$4 sm:$0xff]   ;;  %v765_v19 = vld [vmem:[#allocation7 + $0x70] ss:$8 sps:$4 sm:$0xff]   ;;  %v943_v20 = vmov 0   ;;  %v766_v21 = vld [vmem:[#allocation8 + $0x40] sm:$0xff]  }
  0x61   :  { %274 = vmatpush1.bf16.msra.mxu1 %v747_v7  ;;  %303 = vmatprep.mubr.bf16.mxu1 %v943_v20  ;;  %v767_v22 = vld [vmem:[#allocation8] sm:$0xff]   ;;  %v768_v23 = vld [vmem:[#allocation8 + $0x48] sm:$0xff]   ;;  %v770_v25 = vld [vmem:[#allocation8 + $0x50] sm:$0xff]   ;;  %v182_v52 = vshrl.u32 %v181_v51, 7  ;;  %s944_s13 = smov [#allocation11]  }
  0x62   :  { %275 = vmatprep.subr.bf16.mxu1 %v748_v8  ;;  %671 = vmatprep.subr.bf16.mxu0 %v766_v21  ;;  %v769_v24 = vld [vmem:[#allocation8 + $0x8] sm:$0xff]   ;;  %v771_v26 = vld [vmem:[#allocation8 + $0x10] sm:$0xff]   ;;  %v772_v27 = vld [vmem:[#allocation8 + $0x58] sm:$0xff]  }
  0x63   :  { %672 = vmatpush3.bf16.msra.mxu0 %v767_v22  ;;  %v773_v28 = vld [vmem:[#allocation8 + $0x18] sm:$0xff]   ;;  %v774_v29 = vld [vmem:[#allocation8 + $0x60] sm:$0xff]   ;;  %v776_v31 = vld [vmem:[#allocation8 + $0x68] sm:$0xff]   ;;  %v183_v53 = vsub.s32 0, %v182_v52  ;;  %v187_v55 = vsub.s32 1, %v182_v52 }
  0x64   :  { %673 = vmatprep.subr.bf16.mxu0 %v768_v23  ;;  %v775_v30 = vld [vmem:[#allocation8 + $0x20] sm:$0xff]   ;;  %v777_v32 = vld [vmem:[#allocation8 + $0x28] sm:$0xff]   ;;  %v624_v33 = vld [vmem:[%s1103_s2] ss:$0 sm:$0xff] }
  0x65   :  { %276 = vmatpush1.bf16.msra.mxu1 %v750_v9  ;;  %v778_v41 = vld [vmem:[#allocation8 + $0x70] sm:$0xff]   ;;  %v780_v43 = vld [vmem:[#allocation8 + $0x78] sm:$0xff]   ;;  %v782_v45 = vld [vmem:[#allocation10] sm:$0xff]  }
  0x66   :  { %277 = vmatprep.subr.bf16.mxu1 %v751_v10  ;;  %v779_v42 = vld [vmem:[#allocation8 + $0x30] sm:$0xff]   ;;  %v781_v44 = vld [vmem:[#allocation8 + $0x38] sm:$0xff]   ;;  %v783_v46 = vld [vmem:[#allocation10 + $0x8] sm:$0xff]  }
  0x67   :  { %674 = vmatpush3.bf16.msra.mxu0 %v769_v24  ;;  %v784_v47 = vld [vmem:[#allocation10 + $0x10] sm:$0xff]   ;;  %v785_v48 = vld [vmem:[#allocation10 + $0x18] sm:$0xff]   ;;  %v786_v49 = vld [vmem:[#allocation10 + $0x20] sm:$0xff]  }
  0x68   :  { %675 = vmatprep.subr.bf16.mxu0 %v770_v25  ;;  %v787_v50 = vld [vmem:[#allocation10 + $0x28] sm:$0xff]   ;;  %v179_v54 = vld [vmem:[%s1105_s4] sm:$0x3]  ;;  %v789_v6 = vld [vmem:[#allocation10 + $0x38] sm:$0xff]  }
  0x69   :  { %278 = vmatpush1.bf16.msra.mxu1 %v753_v11  ;;  %v184_v56 = vrot.slane %v179_v54, %v183_v53  ;;  %v188_v57 = vrot.slane %v179_v54, %v187_v55  ;;  %v788_v5 = vld [vmem:[#allocation10 + $0x30] sm:$0xff]  }
  0x6a   :  { %279 = vmatprep.subr.bf16.mxu1 %v754_v12  ;;  %v643_v8 = vld [vmem:[%s1107_s6] ss:$0 sm:$0xff]  ;;  %s613_s6 = sshll.u32 %s944_s13, 4  ;;  %s614_s6 = int_to_ptr.vmem [resolvable:$true] %s613_s6 }
  0x6b   :  { %676 = vmatpush3.bf16.msra.mxu0 %v771_v26  ;;  %s902_s1 = scalar_lea.vmem %s614_s6, 32  ;;  %p907_p13 = scmp.lt.s32.totalorder %s614_s6, %s614_s6 }
  0x6c   :  { %677 = vmatprep.subr.bf16.mxu0 %v772_v27  ;;  %p903_p12 = scmp.ne.s32.totalorder %s614_s6, %s902_s1  ;;  %p908_p0 = scmp.lt.s32.totalorder %s902_s1, %s902_s1 }
  0x6d   :  { %280 = vmatpush1.bf16.msra.mxu1 %v756_v13 }
  0x6e   :  { %281 = vmatprep.subr.bf16.mxu1 %v757_v14  ;;  %p909_p1 = por %p908_p0, %p907_p13 }
  0x6f   :  { %678 = vmatpush3.bf16.msra.mxu0 %v773_v28 }
  0x70   :  { %679 = vmatprep.subr.bf16.mxu0 %v774_v29  ;;  %p910_p2 = pnand %p909_p1, %p903_p12 }
  0x71   :  { %282 = vmatpush1.bf16.msra.mxu1 %v759_v15 }
  0x72   :  { %283 = vmatprep.subr.bf16.mxu1 %v760_v16  ;;  %v660_v16 = vld [vmem:[%s1109_s8] ss:$0 sm:$0xff] }
  0x73   :  { %680 = vmatpush3.bf16.msra.mxu0 %v775_v30 }
  0x74   :  { %681 = vmatprep.subr.bf16.mxu0 %v776_v31 }
  0x75   :  { %284 = vmatpush1.bf16.msra.mxu1 %v762_v17 }
  0x76   :  { %285 = vmatprep.subr.bf16.mxu1 %v763_v18 }
  0x77   :  { %682 = vmatpush3.bf16.msra.mxu0 %v777_v32 }
  0x78   :  { %683 = vmatprep.subr.bf16.mxu0 %v778_v41 }
  0x79   :  { %286 = vmatpush1.bf16.msra.mxu1 %v765_v19 }
  0x7a   :  { %708 = vmatprep.subr.bf16.mxu1 %v941_v0 }
  0x7b   :  { %684 = vmatpush3.bf16.msra.mxu0 %v779_v42 }
  0x7c   :  { %685 = vmatprep.subr.bf16.mxu0 %v780_v43 }
  0x7f   :  { %686 = vmatpush3.bf16.msra.mxu0 %v781_v44 }
 0x132   :  { %v155_v34 = vpop.f32.mrb[0].mxu0 }
 0x133   :  { %v156_v35 = vadd.f32 %v624_v33, %v155_v34  ;;  %v706_v36 = vpop.f32.mrb[1].mxu0 }
 0x134   :  { %v158_v37 = vpop.f32.mrb[2].mxu0 }
 0x135   :  { %v161_v38 = vmax.f32 %v156_v35, 0.0  ;;  %v707_v39 = vpop.f32.mrb[3].mxu0 }
 0x137   :  { %v162_v40 = vpack.c.bf16 %v161_v38, %v161_v38 }
 0x139   :  { %304 = vmatmul.mubr.bf16.vlgmr.msra.gmra.mrb[0].mxu1 %v162_v40 }
 0x13a   :  { %724 = vmatprep.mubr.msk.bf16.mxu1 %vm942_vm0, %v941_v0  ;;  %709 = vmatpush3.bf16.msra.mxu1 %v782_v45 }
 0x13b   :  { %710 = vmatprep.subr.bf16.mxu1 %v941_v0 }
 0x13e   :  { %711 = vmatpush3.bf16.msra.mxu1 %v783_v46 }
 0x13f   :  { %712 = vmatprep.subr.bf16.mxu1 %v941_v0 }
 0x142   :  { %713 = vmatpush3.bf16.msra.mxu1 %v784_v47 }
 0x143   :  { %714 = vmatprep.subr.bf16.mxu1 %v941_v0 }
 0x146   :  { %715 = vmatpush3.bf16.msra.mxu1 %v785_v48 }
 0x147   :  { %716 = vmatprep.subr.bf16.mxu1 %v941_v0 }
 0x14a   :  { %717 = vmatpush3.bf16.msra.mxu1 %v786_v49 }
 0x14b   :  { %718 = vmatprep.subr.bf16.mxu1 %v941_v0 }
 0x14e   :  { %719 = vmatpush3.bf16.msra.mxu1 %v787_v50 }
 0x14f   :  { %720 = vmatprep.subr.bf16.mxu1 %v941_v0 }
 0x152   :  { %721 = vmatpush3.bf16.msra.mxu1 %v788_v5 }
 0x153   :  { %722 = vmatprep.subr.bf16.mxu1 %v941_v0 }
 0x156   :  { %723 = vmatpush3.bf16.msra.mxu1 %v789_v6 }
 0x20c   :  { %v305_v58 = vpop.f32.mrb[0].mxu1 }
 0x20d   :  { %v306_v59 = vadd.f32 %v305_v58, %v184_v56  ;;  %v307_v60 = vpop.f32.mrb[1].mxu1 }
 0x20e   :  { %v308_v61 = vadd.f32 %v307_v60, %v188_v57  ;;  %v309_v62 = vpop.f32.mrb[2].mxu1 }
 0x20f   :  { %v312_v63 = vmax.f32 %v306_v59, 0.0  ;;  %v310_v1 = vpop.f32.mrb[3].mxu1 }
 0x210   :  { %v313_v2 = vmax.f32 %v308_v61, 0.0 }
 0x211   :  { %v314_v4 = vpack.c.bf16 %v312_v63, %v312_v63 }
 0x212   :  { %v315_v3 = vpack.c.bf16 %v313_v2, %v313_v2 }
 0x214   :  { %483 = vmatprep.mubr.bf16.mxu0 %v315_v3 }
 0x215   :  { %484 = vmatmul.mubr.bf16.vlgmr.msra.gmra.mrb[4].mxu0 %v314_v4 }
 0x2e8   :  { %v687_v7 = vpop.f32.mrb[4].mxu0 }
 0x2e9   :  { %v688_v9 = vpop.f32.mrb[5].mxu0 }
 0x2ea   :  { %v689_v10 = vadd.f32 %v688_v9, %v687_v7  ;;  %v690_v11 = vpop.f32.mrb[6].mxu0 }
 0x2eb   :  { %v691_v12 = vpop.f32.mrb[7].mxu0 }
 0x2ec   :  { %v486_v13 = vadd.f32 %v689_v10, %v643_v8 }
 0x2ee   :  { %v491_v14 = vmax.f32 %v486_v13, 0.0 }
 0x2f0   :  { %v492_v15 = vpack.c.bf16 %v491_v14, %v491_v14 }
 0x2f2   :  { %725 = vmatmul.mubr.bf16.vlgmr.msra.gmra.mrb[4].mxu1 %v492_v15 }
 0x3c5   :  { %v598_v0 = vpop.f32.mrb[4].mxu1 }
 0x3c6   :  { %v599_v17 = vadd.f32 %v660_v16, %v598_v0  ;;  %v726_v18 = vpop.f32.mrb[5].mxu1 }
 0x3c7   :  { %v601_v19 = vpop.f32.mrb[6].mxu1 }
 0x3c8   :  { %790 = vtanh.f32 %v599_v17  ;;  %v727_v20 = vpop.f32.mrb[7].mxu1 }
 0x3d2   :  { %v791_v21 = vpop.eup %790 }
 0x3d3   :  { %v605_v22 = vmul.f32 2.0, %v791_v21 }
 0x3d5   :  { %606 = vst [vmem:[#allocation11] sm:$0x3] %v605_v22 }
 0x3d6   :  { %913 = shalt.err (!%p910_p2)
}
 0x3d7   :  { %s914_s14 = scalar_lea.hbm %s1110_s9, 32 }
 0x3d8   :  { %p915_p3 = scmp.ne.s32.totalorder %s1110_s9, %s914_s14  ;;  %p918_p4 = scmp.lt.u32.totalorder %s914_s14, %s1110_s9 }
 0x3da   :  { %p920_p5 = pnand %p918_p4, %p915_p3 }
 0x3dc   :  { %923 = shalt.err (!%p920_p5)
}
 0x3dd   :  { %616 = dma.vmem_to_hbm [thread:$0]  %s614_s6, 32, %s1110_s9, [#allocation4]  }
 0x3de   :  { %930 = dma.done.wait [#allocation4], 32  }
 0x3df   :  { %931 = vsyncadd [#allocation4], 4294967264 }
 0x3e0   :  { %620 = vsyncpa [#allocation3], 1 }
 0x3e1   :  { %621 = vsyncpa [#allocation6], 1 }
 0x3e2   :  { %622 = vsyncpa [#allocation9], 1 }
 0x3e3   :  { %623 = vsyncpa [#allocation4], 1 }

</bundles_post_ra>
